<compile_context>
chip_gen: v7x
topology: tpu7x:2x2x1
jax: 0.10.0
libtpu: 0.0.40
codegen_flags: <defaults>
</compile_context>

<pallas_src>
import functools
from math import prod, sqrt

import jax
import jax.numpy as jnp
from jax.experimental import pallas as pl
from jax.experimental.pallas import tpu as pltpu

_INV_SQRT2 = 1.0 / sqrt(2.0)


def _round_up(x, m):
    return (x + m - 1) // m * m


# --------------------------------------------------------------------------------------
# Kernels
# --------------------------------------------------------------------------------------
def _ffn_fused_kernel(x_ref, w1_ref, b1_ref, w2_ref, b2_ref, o_ref):
    """Weights fully resident in VMEM; one token tile per grid step."""
    # (tm, dim_p) @ (dim_p, hid_p): f32 accumulation on the MXU, bias added in f32.
    h = jnp.dot(x_ref[...], w1_ref[...], preferred_element_type=jnp.float32) + b1_ref[...]
    # Exact erf GELU (torch.nn.GELU(approximate='none')), computed in f32.
    h = 0.5 * h * (1.0 + jax.lax.erf(h * _INV_SQRT2))
    # Dropout(p=0.0) == identity (omitted).
    y = jnp.dot(h.astype(w2_ref.dtype), w2_ref[...],
                preferred_element_type=jnp.float32) + b2_ref[...]
    o_ref[...] = y.astype(o_ref.dtype)


def _ffn_hidden_tiled_kernel(x_ref, w1_ref, b1_ref, w2_ref, b2_ref, o_ref, acc_ref):
    """Hidden axis tiled: grid=(M/tm, hid/th); per-token-tile f32 accumulator in VMEM."""
    k = pl.program_id(1)

    @pl.when(k == 0)
    def _init():
        acc_ref[...] = jnp.zeros_like(acc_ref)

    h = jnp.dot(x_ref[...], w1_ref[...], preferred_element_type=jnp.float32) + b1_ref[...]
    h = 0.5 * h * (1.0 + jax.lax.erf(h * _INV_SQRT2))
    acc_ref[...] += jnp.dot(h.astype(w2_ref.dtype), w2_ref[...],
                            preferred_element_type=jnp.float32)

    @pl.when(k == pl.num_programs(1) - 1)
    def _finalize():
        o_ref[...] = (acc_ref[...] + b2_ref[...]).astype(o_ref.dtype)


# --------------------------------------------------------------------------------------
# Feature / hardware probes
# --------------------------------------------------------------------------------------
@functools.cache
def _single_buffer_supported() -> bool:
    """Probe pl.Buffered(1) support on a tiny standalone copy kernel (cached; run outside jit).

    Unlike the previous blanket try/except around the production pallas_call, a ~4 KiB probe
    cannot mask a genuine VMEM OOM or lowering bug of the real kernel -- it only detects
    whether this JAX build accepts BlockSpec(pipeline_mode=pl.Buffered(1)).
    """
    if not hasattr(pl, "Buffered"):
        return False

    def _copy(x_ref, o_ref):
        o_ref[...] = x_ref[...]

    try:
        out = pl.pallas_call(
            _copy,
            out_shape=jax.ShapeDtypeStruct((8, 128), jnp.float32),
            grid=(1,),
            in_specs=[pl.BlockSpec((8, 128), lambda i: (0, 0),
                                   pipeline_mode=pl.Buffered(1))],
            out_specs=pl.BlockSpec((8, 128), lambda i: (0, 0)),
        )(jnp.zeros((8, 128), jnp.float32))
        jax.block_until_ready(out)
        return True
    except Exception:  # feature probe only; the production pallas_call is NOT wrapped
        return False


@functools.cache
def _vmem_capacity_bytes() -> int:
    try:
        return int(pltpu.get_tpu_info().vmem_capacity_bytes)
    except Exception:  # hardware-info query only; conservative v7x per-TC fallback
        return 64 << 20


# --------------------------------------------------------------------------------------
# Wrappers
# --------------------------------------------------------------------------------------
def prepare_ffn_params(w1, b1, w2, b2, *, use_bf16_operands=True):
    """Pad dim/hidden to lane-dense multiples of 128 and cast weights ONCE.

    Call once per layer and reuse across steps (hoists the weight pad/cast HBM round trip out
    of the per-call path).  Zero-padded weight rows/cols and biases contribute exactly 0, so
    numerics are unchanged.  Default: bf16 matmul operands with f32 accumulation (documented
    accuracy trade-off); use_bf16_operands=False keeps torch-exact f32 operands.
    """
    dim, hidden = w1.shape
    assert w2.shape == (hidden, dim) and b1.shape == (hidden,) and b2.shape == (dim,)
    dim_p, hid_p = _round_up(dim, 128), _round_up(hidden, 128)
    w_dtype = jnp.bfloat16 if use_bf16_operands else w1.dtype
    return dict(
        w1=jnp.pad(w1, ((0, dim_p - dim), (0, hid_p - hidden))).astype(w_dtype),
        w2=jnp.pad(w2, ((0, hid_p - hidden), (0, dim_p - dim))).astype(w_dtype),
        b1=jnp.pad(b1, (0, hid_p - hidden)).reshape(1, hid_p).astype(jnp.float32),
        b2=jnp.pad(b2, (0, dim_p - dim)).reshape(1, dim_p).astype(jnp.float32),
        dim=dim, hidden=hidden, dim_p=dim_p, hid_p=hid_p,
        use_bf16_operands=use_bf16_operands,
    )


def _choose_tm(M, sublane, tm_max):
    """Token-tile size: prefer an exact divisor of M (no pad + output-slice HBM round trip)
    and >= 2 grid steps so "parallel" can shard the token axis across the 2 v7x TCs."""
    tm_max = max(sublane, tm_max // sublane * sublane)
    divisors = [t for t in range(sublane, min(tm_max, M) + 1, sublane) if M % t == 0]
    if divisors:
        multi_step = [t for t in divisors if M // t >= 2]
        tm = max(multi_step) if multi_step else max(divisors)
        return tm, M
    # Ragged token count: pad up to a multiple of tm.
    # TODO(synk): handle the ragged tail with a masked tail tile instead of pad + slice.
    tm = min(tm_max, _round_up(M, sublane))
    return tm, _round_up(M, tm)


def feed_forward_prepared(x, params, *, tm_max=512, th_max=512, force_hidden_tiled=False):
    """FeedForward forward pass using pre-padded params (see prepare_ffn_params).

    x: (..., dim) -> (..., dim), same dtype as x.
    """
    dim, hidden = params["dim"], params["hidden"]
    dim_p, hid_p = params["dim_p"], params["hid_p"]
    use_bf16 = params["use_bf16_operands"]
    w1, b1, w2, b2 = params["w1"], params["b1"], params["w2"], params["b2"]

    assert x.shape[-1] == dim
    lead = x.shape[:-1]
    M = int(prod(lead)) if lead else 1

    x_dtype = jnp.bfloat16 if use_bf16 else x.dtype
    xb = jnp.dtype(x_dtype).itemsize
    ob = jnp.dtype(x.dtype).itemsize
    wb = jnp.dtype(w1.dtype).itemsize
    sublane = 16 if xb == 2 else 8
    tm, M_p = _choose_tm(M, sublane, tm_max)
    num_m = M_p // tm

    # Cast in the wrapper (bf16 x tile => half the HBM->VMEM bytes, no in-kernel VALU cast).
    x2 = x.reshape(M, dim).astype(x_dtype)
    if (M_p, dim_p) != (M, dim):
        x2 = jnp.pad(x2, ((0, M_p - M), (0, dim_p - dim)))

    # ---- explicit per-buffer VMEM accounting (no blanket fudge factor) ----------------
    single_buf = _single_buffer_supported()
    w_copies = 1 if single_buf else 2

    def fused_bytes():
        return (2 * tm * dim_p * xb                       # x tile, double-buffered
                + 2 * tm * dim_p * ob                     # out tile, double-buffered
                + w_copies * 2 * dim_p * hid_p * wb       # resident W1 + W2
                + 2 * (hid_p + dim_p) * 4                 # biases (f32, tiny)
                + tm * hid_p * 4                          # f32 intermediate h
                + (tm * hid_p * 2 if use_bf16 else 0))    # bf16 copy of h for 2nd matmul

    def tiled_bytes(th):
        return (2 * tm * dim_p * xb
                + 2 * tm * dim_p * ob
                + 2 * 2 * dim_p * th * wb                 # W1/W2 hidden-slices, double-buffered
                + 2 * (th + dim_p) * 4                    # bias tiles
                + tm * dim_p * 4                          # f32 accumulator scratch
                + tm * th * 4                             # f32 intermediate h tile
                + (tm * th * 2 if use_bf16 else 0))

    vmem_cap = _vmem_capacity_bytes()
    budget = int(0.75 * min(vmem_cap, 128 << 20))
    use_fused = (not force_hidden_tiled) and fused_bytes() <= budget

    if use_fused:
        def resident(shape):  # big weights: resident in VMEM, single-buffered when supported
            if single_buf:
                return pl.BlockSpec(shape, lambda i: (0, 0), pipeline_mode=pl.Buffered(1))
            return pl.BlockSpec(shape, lambda i: (0, 0))

        est = fused_bytes()
        kernel = _ffn_fused_kernel
        grid_spec = pltpu.PrefetchScalarGridSpec(
            num_scalar_prefetch=0,
            grid=(num_m,),
            in_specs=[
                pl.BlockSpec((tm, dim_p), lambda i: (i, 0)),     # x tile (pipelined)
                resident((dim_p, hid_p)),                        # W1
                pl.BlockSpec((1, hid_p), lambda i: (0, 0)),      # b1
                resident((hid_p, dim_p)),                        # W2
                pl.BlockSpec((1, dim_p), lambda i: (0, 0)),      # b2
            ],
            out_specs=pl.BlockSpec((tm, dim_p), lambda i: (i, 0)),
        )
        dim_sem = ("parallel",)
        weight_reads = 1
    else:
        cands = [t for t in range(128, min(th_max, hid_p) + 1, 128) if hid_p % t == 0]
        th = next((t for t in sorted(cands, reverse=True) if tiled_bytes(t) <= budget), 128)
        est = tiled_bytes(th)
        kernel = _ffn_hidden_tiled_kernel
        grid_spec = pltpu.PrefetchScalarGridSpec(
            num_scalar_prefetch=0,
            grid=(num_m, hid_p // th),                           # reduction (hidden) axis last
            in_specs=[
                pl.BlockSpec((tm, dim_p), lambda i, k: (i, 0)),  # x tile (constant over k)
                pl.BlockSpec((dim_p, th), lambda i, k: (0, k)),  # W1 hidden slice
                pl.BlockSpec((1, th), lambda i, k: (0, k)),      # b1 hidden slice
                pl.BlockSpec((th, dim_p), lambda i, k: (k, 0)),  # W2 hidden slice
                pl.BlockSpec((1, dim_p), lambda i, k: (0, 0)),   # b2
            ],
            out_specs=pl.BlockSpec((tm, dim_p), lambda i, k: (i, 0)),
            scratch_shapes=[pltpu.VMEM((tm, dim_p), jnp.float32)],
        )
        dim_sem = ("parallel", "arbitrary")
        weight_reads = num_m                                     # W tiles stream per token tile

    headroom = 2 << 20  # Mosaic-internal scratch / semaphores / small fused temporaries
    vmem_limit = int(min(max(est + headroom, 16 << 20), int(0.9 * vmem_cap)))

    cost = pl.CostEstimate(
        flops=int(4 * M_p * dim_p * hid_p),                      # two matmuls
        transcendentals=int(M_p * hid_p),                        # erf
        bytes_accessed=int(M_p * dim_p * (xb + ob)
                           + weight_reads * 2 * dim_p * hid_p * wb
                           + (hid_p + dim_p) * 4),
    )

    out = pl.pallas_call(
        kernel,
        out_shape=jax.ShapeDtypeStruct((M_p, dim_p), x.dtype),
        grid_spec=grid_spec,
        compiler_params=pltpu.CompilerParams(
            dimension_semantics=dim_sem,
            vmem_limit_bytes=vmem_limit,
        ),
        cost_estimate=cost,
    )(x2, w1, b1, w2, b2)

    if (M_p, dim_p) != (M, dim):
        out = out[:M, :dim]
    return out.reshape(lead + (dim,))


def feed_forward(x, w1, b1, w2, b2, *, use_bf16_operands=True, tm_max=512, th_max=512,
                 force_hidden_tiled=False):
    """One-shot convenience wrapper (pads/casts the weights on every call).
    Prefer prepare_ffn_params(...) + feed_forward_prepared(...) for repeated calls."""
    params = prepare_ffn_params(w1, b1, w2, b2, use_bf16_operands=use_bf16_operands)
    return feed_forward_prepared(x, params, tm_max=tm_max, th_max=th_max,
                                 force_hidden_tiled=force_hidden_tiled)


def _reference(x, w1, b1, w2, b2):
    hi = jax.lax.Precision.HIGHEST
    h = jnp.matmul(x, w1, precision=hi) + b1
    h = 0.5 * h * (1.0 + jax.lax.erf(h * _INV_SQRT2))
    return jnp.matmul(h, w2, precision=hi) + b2


if __name__ == "__main__":
    # Small ViT-style FeedForward shapes.
    batch, seq, dim, hidden = 2, 8, 32, 64

    key = jax.random.PRNGKey(0)
    kx, kw1, kb1, kw2, kb2, kx2, kw3, kb3, kw4, kb4 = jax.random.split(key, 10)

    x = jax.random.normal(kx, (batch, seq, dim), dtype=jnp.float32)
    bound1 = 1.0 / sqrt(dim)
    w1 = jax.random.uniform(kw1, (dim, hidden), minval=-bound1, maxval=bound1, dtype=jnp.float32)
    b1 = jax.random.uniform(kb1, (hidden,), minval=-bound1, maxval=bound1, dtype=jnp.float32)
    bound2 = 1.0 / sqrt(hidden)
    w2 = jax.random.uniform(kw2, (hidden, dim), minval=-bound2, maxval=bound2, dtype=jnp.float32)
    b2 = jax.random.uniform(kb2, (dim,), minval=-bound2, maxval=bound2, dtype=jnp.float32)

    ref = _reference(x, w1, b1, w2, b2)

    # 1) Default path: bf16 MXU operands, f32 accumulation, weights prepared once and reused.
    prepared = prepare_ffn_params(w1, b1, w2, b2)  # use_bf16_operands=True by default
    out_bf16 = jax.block_until_ready(feed_forward_prepared(x, prepared))
    assert out_bf16.shape == (batch, seq, dim)
    assert jnp.allclose(out_bf16, ref, atol=5e-2, rtol=5e-2), "bf16 path mismatch vs reference"

    # 2) Opt-in torch-exact path: f32 matmul operands.
    out_f32 = jax.block_until_ready(feed_forward(x, w1, b1, w2, b2, use_bf16_operands=False))
    assert out_f32.shape == (batch, seq, dim)
    assert jnp.allclose(out_f32, ref, atol=1e-5, rtol=1e-5), "f32 path mismatch vs reference"

    # 3) Hidden-tiled accumulator variant (the large-shape / v7x-VMEM path), exercised with a
    #    ragged token count (forces the M-padding fallback) and 2 hidden-tile grid steps.
    seq_b, hidden_b = 9, 256
    x_b = jax.random.normal(kx2, (batch, seq_b, dim), dtype=jnp.float32)
    bound3 = 1.0 / sqrt(dim)
    w1b = jax.random.uniform(kw3, (dim, hidden_b), minval=-bound3, maxval=bound3, dtype=jnp.float32)
    b1b = jax.random.uniform(kb3, (hidden_b,), minval=-bound3, maxval=bound3, dtype=jnp.float32)
    bound4 = 1.0 / sqrt(hidden_b)
    w2b = jax.random.uniform(kw4, (hidden_b, dim), minval=-bound4, maxval=bound4, dtype=jnp.float32)
    b2b = jax.random.uniform(kb4, (dim,), minval=-bound4, maxval=bound4, dtype=jnp.float32)
    ref_b = _reference(x_b, w1b, b1b, w2b, b2b)
    out_tiled = jax.block_until_ready(
        feed_forward(x_b, w1b, b1b, w2b, b2b, use_bf16_operands=False,
                     force_hidden_tiled=True, th_max=128))
    assert out_tiled.shape == (batch, seq_b, dim)
    assert jnp.allclose(out_tiled, ref_b, atol=1e-5, rtol=1e-5), "hidden-tiled path mismatch"

    print("KERNEL_OK")
</pallas_src>

<mosaic_0001>
module attributes {stable_mosaic.version = 11 : i64} {
  func.func @_copy(%arg0: i32, %arg1: memref<8x128xf32, #tpu.memory_space<vmem>>, %arg2: memref<8x128xf32, #tpu.memory_space<vmem>>) attributes {dimension_semantics = [#tpu.dimension_semantics<arbitrary>], iteration_bounds = array<i64: 1>, scalar_prefetch = 0 : i64, scratch_operands = 0 : i64, tpu.core_type = #tpu.core_type<tc>, window_params = [{pipeline_mode = #tpu.pipeline_mode<synchronous>, transform_indices = @transform_0, window_bounds = array<i64: 8, 128>}, {pipeline_mode = #tpu.pipeline_mode<synchronous>, transform_indices = @transform_1, window_bounds = array<i64: 8, 128>}]} {
    %c0 = arith.constant 0 : index
    %c0_0 = arith.constant 0 : index
    %0 = vector.load %arg1[%c0, %c0_0] : memref<8x128xf32, #tpu.memory_space<vmem>>, vector<8x128xf32>
    %c0_1 = arith.constant 0 : index
    %c0_2 = arith.constant 0 : index
    %1 = vector.load %arg2[%c0_1, %c0_2] : memref<8x128xf32, #tpu.memory_space<vmem>>, vector<8x128xf32>
    tpu.vector_store %arg2[%c0_1, %c0_2], %0 {strides = array<i32>} : memref<8x128xf32, #tpu.memory_space<vmem>>, vector<8x128xf32>,
    return
  }
  func.func @transform_0(%arg0: i32) -> (i32, i32) {
    %c0_i32 = arith.constant 0 : i32
    %c0_i32_0 = arith.constant 0 : i32
    %c0_i32_1 = arith.constant 0 : i32
    return %c0_i32, %c0_i32_0 : i32, i32
  }
  func.func @transform_1(%arg0: i32) -> (i32, i32) {
    %c0_i32 = arith.constant 0 : i32
    %c0_i32_0 = arith.constant 0 : i32
    %c0_i32_1 = arith.constant 0 : i32
    return %c0_i32, %c0_i32_0 : i32, i32
  }
}

module attributes {stable_mosaic.version = 11 : i64} {
  func.func @_ffn_fused_kernel(%arg0: i32, %arg1: memref<16x128xbf16, #tpu.memory_space<vmem>>, %arg2: memref<128x128xbf16, #tpu.memory_space<vmem>>, %arg3: memref<1x128xf32, #tpu.memory_space<vmem>>, %arg4: memref<128x128xbf16, #tpu.memory_space<vmem>>, %arg5: memref<1x128xf32, #tpu.memory_space<vmem>>, %arg6: memref<16x128xf32, #tpu.memory_space<vmem>>) attributes {dimension_semantics = [#tpu.dimension_semantics<parallel>], iteration_bounds = array<i64: 1>, scalar_prefetch = 0 : i64, scratch_operands = 0 : i64, tpu.core_type = #tpu.core_type<tc>, window_params = [{transform_indices = @transform_0, window_bounds = array<i64: 16, 128>}, {pipeline_mode = #tpu.pipeline_mode<synchronous>, transform_indices = @transform_1, window_bounds = array<i64: 128, 128>}, {pipeline_mode = #tpu.pipeline_mode<synchronous>, transform_indices = @transform_2, window_bounds = array<i64: 1, 128>}, {pipeline_mode = #tpu.pipeline_mode<synchronous>, transform_indices = @transform_3, window_bounds = array<i64: 128, 128>}, {pipeline_mode = #tpu.pipeline_mode<synchronous>, transform_indices = @transform_4, window_bounds = array<i64: 1, 128>}, {transform_indices = @transform_5, window_bounds = array<i64: 16, 128>}]} {
    %c0 = arith.constant 0 : index
    %c0_0 = arith.constant 0 : index
    %0 = vector.load %arg1[%c0, %c0_0] : memref<16x128xbf16, #tpu.memory_space<vmem>>, vector<16x128xbf16>
    %c0_1 = arith.constant 0 : index
    %c0_2 = arith.constant 0 : index
    %1 = vector.load %arg2[%c0_1, %c0_2] : memref<128x128xbf16, #tpu.memory_space<vmem>>, vector<128x128xbf16>
    %cst = arith.constant dense<0.000000e+00> : vector<16x128xf32>
    %2 = tpu.matmul %0, %1, %cst {dimension_numbers = #tpu.dot_dimension_numbers<[1], [0], [0], [1], [0, 0, 1, 1], [], []>} : vector<16x128xbf16>, vector<128x128xbf16>, vector<16x128xf32> -> vector<16x128xf32>
    %c0_3 = arith.constant 0 : index
    %c0_4 = arith.constant 0 : index
    %3 = vector.load %arg3[%c0_3, %c0_4] : memref<1x128xf32, #tpu.memory_space<vmem>>, vector<1x128xf32>
    %4 = vector.broadcast %3 : vector<1x128xf32> to vector<16x128xf32>
    %5 = arith.addf %2, %4 : vector<16x128xf32>
    %cst_5 = arith.constant 5.000000e-01 : f32
    %6 = vector.broadcast %cst_5 : f32 to vector<16x128xf32>
    %7 = arith.mulf %6, %5 : vector<16x128xf32>
    %cst_6 = arith.constant 0.707106769 : f32
    %8 = vector.broadcast %cst_6 : f32 to vector<16x128xf32>
    %9 = arith.mulf %5, %8 : vector<16x128xf32>
    %10 = math.erf %9 : vector<16x128xf32>
    %cst_7 = arith.constant 1.000000e+00 : f32
    %11 = vector.broadcast %cst_7 : f32 to vector<16x128xf32>
    %12 = arith.addf %11, %10 : vector<16x128xf32>
    %13 = arith.mulf %7, %12 : vector<16x128xf32>
    %14 = arith.truncf %13 : vector<16x128xf32> to vector<16x128xbf16>
    %c0_8 = arith.constant 0 : index
    %c0_9 = arith.constant 0 : index
    %15 = vector.load %arg4[%c0_8, %c0_9] : memref<128x128xbf16, #tpu.memory_space<vmem>>, vector<128x128xbf16>
    %cst_10 = arith.constant dense<0.000000e+00> : vector<16x128xf32>
    %16 = tpu.matmul %14, %15, %cst_10 {dimension_numbers = #tpu.dot_dimension_numbers<[1], [0], [0], [1], [0, 0, 1, 1], [], []>} : vector<16x128xbf16>, vector<128x128xbf16>, vector<16x128xf32> -> vector<16x128xf32>
    %c0_11 = arith.constant 0 : index
    %c0_12 = arith.constant 0 : index
    %17 = vector.load %arg5[%c0_11, %c0_12] : memref<1x128xf32, #tpu.memory_space<vmem>>, vector<1x128xf32>
    %18 = vector.broadcast %17 : vector<1x128xf32> to vector<16x128xf32>
    %19 = arith.addf %16, %18 : vector<16x128xf32>
    %c0_13 = arith.constant 0 : index
    %c0_14 = arith.constant 0 : index
    %20 = vector.load %arg6[%c0_13, %c0_14] : memref<16x128xf32, #tpu.memory_space<vmem>>, vector<16x128xf32>
    tpu.vector_store %arg6[%c0_13, %c0_14], %19 {strides = array<i32>} : memref<16x128xf32, #tpu.memory_space<vmem>>, vector<16x128xf32>,
    return
  }
  func.func @transform_0(%arg0: i32) -> (i32, i32) {
    %c0_i32 = arith.constant 0 : i32
    %c0_i32_0 = arith.constant 0 : i32
    return %arg0, %c0_i32 : i32, i32
  }
  func.func @transform_1(%arg0: i32) -> (i32, i32) {
    %c0_i32 = arith.constant 0 : i32
    %c0_i32_0 = arith.constant 0 : i32
    %c0_i32_1 = arith.constant 0 : i32
    return %c0_i32, %c0_i32_0 : i32, i32
  }
  func.func @transform_2(%arg0: i32) -> (i32, i32) {
    %c0_i32 = arith.constant 0 : i32
    %c0_i32_0 = arith.constant 0 : i32
    %c0_i32_1 = arith.constant 0 : i32
    return %c0_i32, %c0_i32_0 : i32, i32
  }
  func.func @transform_3(%arg0: i32) -> (i32, i32) {
    %c0_i32 = arith.constant 0 : i32
    %c0_i32_0 = arith.constant 0 : i32
    %c0_i32_1 = arith.constant 0 : i32
    return %c0_i32, %c0_i32_0 : i32, i32
  }
  func.func @transform_4(%arg0: i32) -> (i32, i32) {
    %c0_i32 = arith.constant 0 : i32
    %c0_i32_0 = arith.constant 0 : i32
    %c0_i32_1 = arith.constant 0 : i32
    return %c0_i32, %c0_i32_0 : i32, i32
  }
  func.func @transform_5(%arg0: i32) -> (i32, i32) {
    %c0_i32 = arith.constant 0 : i32
    %c0_i32_0 = arith.constant 0 : i32
    return %arg0, %c0_i32 : i32, i32
  }
}

</mosaic_0001>

<bundles_post_ra>
// kernel: tpu_custom_call.1
= control target key start
LH: loop header
LB: loop body
LE: loop exit
PB: predicated region body
PF: predicated region fallthrough
CT: control target
= control target key end

     0   :  { %6 = vsyncpa [#allocation3], 0  ;;  %s124_s0 = inlined_call_operand.hbm [shape: f32[8,128], index: 0, kind: input, shape index: {}]   ;;  %s125_s1 = inlined_call_operand.hbm [shape: f32[8,128], index: 1, kind: output, shape index: {}]  }
   0x1   :  { %7 = vsyncpa [#allocation4], 0  ;;  %s88_s6 = smov [#allocation2]   ;;  %s40_s10 = scalar_lea.hbm %s124_s0, 128 }
   0x2   :  { %s14_s7 = sshll.u32 %s88_s6, 4  ;;  %p41_p0 = scmp.ne.s32.totalorder %s124_s0, %s40_s10  ;;  %s15_s7 = int_to_ptr.vmem [resolvable:$true] %s14_s7 }
   0x3   :  { %p44_p1 = scmp.lt.u32.totalorder %s40_s10, %s124_s0 }
   0x5   :  { %p46_p2 = pnand %p44_p1, %p41_p0 }
   0x7   :  { %49 = shalt.err (!%p46_p2)
}
   0x8   :  { %s50_s15 = scalar_lea.vmem %s15_s7, 128  ;;  %p55_p4 = scmp.lt.s32.totalorder %s15_s7, %s15_s7 }
   0x9   :  { %p51_p3 = scmp.ne.s32.totalorder %s15_s7, %s50_s15  ;;  %p56_p5 = scmp.lt.s32.totalorder %s50_s15, %s50_s15 }
   0xb   :  { %p57_p6 = por %p56_p5, %p55_p4 }
   0xd   :  { %p58_p7 = pnand %p57_p6, %p51_p3 }
   0xf   :  { %61 = shalt.err (!%p58_p7)
}
  0x10   :  { %17 = dma.hbm_to_vmem [thread:$0]  %s124_s0, 128, %s15_s7, [#allocation3]  }
  0x11   :  { %84 = dma.done.wait [#allocation3], 128  }
  0x12   :  { %85 = vsyncadd [#allocation3], 4294967168  ;;  %s89_s18 = smov [#allocation5]   ;;  %v21_v0 = vld [vmem:[#allocation2] sm:$0xff] }
  0x13   :  { %s29_s19 = sshll.u32 %s89_s18, 4  ;;  %22 = vst [vmem:[#allocation5] sm:$0xff] %v21_v0  ;;  %s30_s19 = int_to_ptr.vmem [resolvable:$true] %s29_s19 }
  0x14   :  { %s62_s20 = scalar_lea.vmem %s30_s19, 128  ;;  %p67_p9 = scmp.lt.s32.totalorder %s30_s19, %s30_s19 }
  0x15   :  { %p63_p8 = scmp.ne.s32.totalorder %s30_s19, %s62_s20  ;;  %p68_p10 = scmp.lt.s32.totalorder %s62_s20, %s62_s20 }
  0x17   :  { %p69_p11 = por %p68_p10, %p67_p9 }
  0x19   :  { %p70_p12 = pnand %p69_p11, %p63_p8 }
  0x1b   :  { %73 = shalt.err (!%p70_p12)
}
  0x1c   :  { %s74_s23 = scalar_lea.hbm %s125_s1, 128 }
  0x1d   :  { %p75_p13 = scmp.ne.s32.totalorder %s125_s1, %s74_s23  ;;  %p78_p0 = scmp.lt.u32.totalorder %s74_s23, %s125_s1 }
  0x1f   :  { %p80_p1 = pnand %p78_p0, %p75_p13 }
  0x21   :  { %83 = shalt.err (!%p80_p1)
}
  0x22   :  { %32 = dma.vmem_to_hbm [thread:$0]  %s30_s19, 128, %s125_s1, [#allocation4]  }
  0x23   :  { %86 = dma.done.wait [#allocation4], 128  }
  0x24   :  { %87 = vsyncadd [#allocation4], 4294967168 }
  0x25   :  { %36 = vsyncpa [#allocation3], 1 }
  0x26   :  { %37 = vsyncpa [#allocation4], 1 }

// kernel: tpu_custom_call.1
= control target key start
LH: loop header
LB: loop body
LE: loop exit
PB: predicated region body
PF: predicated region fallthrough
CT: control target
= control target key end

     0   :  { %10 = vsyncpa [#allocation3], 0  ;;  %s638_s0 = inlined_call_operand.hbm [shape: bf16[16,128], index: 0, kind: input, shape index: {}]   ;;  %s639_s1 = inlined_call_operand.hbm [shape: bf16[128,128], index: 1, kind: input, shape index: {}]   ;;  %s640_s2 = inlined_call_operand.vmem [shape: f32[1,128], index: 2, kind: input, shape index: {}]   ;;  %s641_s3 = inlined_call_operand.hbm [shape: bf16[128,128], index: 3, kind: input, shape index: {}]   ;;  %s642_s4 = inlined_call_operand.vmem [shape: f32[1,128], index: 4, kind: input, shape index: {}]   ;;  %s643_s5 = inlined_call_operand.hbm [shape: f32[16,128], index: 5, kind: output, shape index: {}]  }
   0x1   :  { %11 = vsyncpa [#allocation6], 0 }
   0x2   :  { %12 = vsyncpa [#allocation4], 0  ;;  %s528_s18 = smov [#allocation5]   ;;  %s529_s20 = smov [#allocation2]  }
   0x3   :  { %s30_s19 = sshll.u32 %s528_s18, 4  ;;  %s18_s21 = sshll.u32 %s529_s20, 4  ;;  %s31_s19 = int_to_ptr.vmem [resolvable:$true] %s30_s19  ;;  %s568_s21 = int_to_ptr.vmem [resolvable:$true] %s18_s21 }
   0x4   :  { %s434_s24 = scalar_lea.hbm %s639_s1, 1024 }
   0x5   :  { %p435_p0 = scmp.ne.s32.totalorder %s639_s1, %s434_s24  ;;  %p438_p1 = scmp.lt.u32.totalorder %s434_s24, %s639_s1 }
   0x7   :  { %p440_p2 = pnand %p438_p1, %p435_p0 }
   0x9   :  { %443 = shalt.err (!%p440_p2)
}
   0xa   :  { %s444_s29 = scalar_lea.vmem %s31_s19, 1024  ;;  %p449_p4 = scmp.lt.s32.totalorder %s31_s19, %s31_s19 }
   0xb   :  { %p445_p3 = scmp.ne.s32.totalorder %s31_s19, %s444_s29  ;;  %p450_p5 = scmp.lt.s32.totalorder %s444_s29, %s444_s29 }
   0xd   :  { %p451_p6 = por %p450_p5, %p449_p4 }
   0xf   :  { %p452_p7 = pnand %p451_p6, %p445_p3 }
  0x11   :  { %455 = shalt.err (!%p452_p7)
}
  0x12   :  { %s530_s30 = smov 64   ;;  %s531_s6 = smov 4  }
  0x13   :  { %36 = dma.hbm_to_vmem [thread:$0]  %s639_s1, 1024, %s31_s19, [#allocation6], %s530_s30, %s530_s30, %s531_s6  }
  0x14   :  { %s456_s11 = scalar_lea.hbm %s638_s0, 128 }
  0x15   :  { %p457_p8 = scmp.ne.s32.totalorder %s638_s0, %s456_s11  ;;  %p460_p9 = scmp.lt.u32.totalorder %s456_s11, %s638_s0 }
  0x17   :  { %p462_p10 = pnand %p460_p9, %p457_p8 }
  0x19   :  { %465 = shalt.err (!%p462_p10)
}
  0x1a   :  { %s466_s16 = scalar_lea.vmem %s568_s21, 128  ;;  %p471_p12 = scmp.lt.s32.totalorder %s568_s21, %s568_s21 }
  0x1b   :  { %p467_p11 = scmp.ne.s32.totalorder %s568_s21, %s466_s16  ;;  %p472_p13 = scmp.lt.s32.totalorder %s466_s16, %s466_s16 }
  0x1d   :  { %p473_p0 = por %p472_p13, %p471_p12 }
  0x1f   :  { %p474_p1 = pnand %p473_p0, %p467_p11 }
  0x21   :  { %477 = shalt.err (!%p474_p1)
}
  0x22   :  { %24 = dma.hbm_to_vmem [thread:$0]  %s638_s0, 128, %s568_s21, [#allocation3], %s530_s30, %s530_s30, %s531_s6  }
  0x23   :  { %s532_s18 = smov [#allocation7]   ;;  %s478_s23 = scalar_lea.hbm %s641_s3, 1024 }
  0x24   :  { %s44_s19 = sshll.u32 %s532_s18, 4  ;;  %p479_p2 = scmp.ne.s32.totalorder %s641_s3, %s478_s23  ;;  %s45_s19 = int_to_ptr.vmem [resolvable:$true] %s44_s19 }
  0x25   :  { %p482_p3 = scmp.lt.u32.totalorder %s478_s23, %s641_s3 }
  0x27   :  { %p484_p4 = pnand %p482_p3, %p479_p2 }
  0x29   :  { %487 = shalt.err (!%p484_p4)
}
  0x2a   :  { %s488_s28 = scalar_lea.vmem %s45_s19, 1024  ;;  %p493_p6 = scmp.lt.s32.totalorder %s45_s19, %s45_s19 }
  0x2b   :  { %p489_p5 = scmp.ne.s32.totalorder %s45_s19, %s488_s28  ;;  %p494_p7 = scmp.lt.s32.totalorder %s488_s28, %s488_s28 }
  0x2d   :  { %p495_p8 = por %p494_p7, %p493_p6 }
  0x2f   :  { %p496_p9 = pnand %p495_p8, %p489_p5 }
  0x31   :  { %499 = shalt.err (!%p496_p9)
}
  0x32   :  { %50 = dma.hbm_to_vmem [thread:$0]  %s641_s3, 1024, %s45_s19, [#allocation6], %s530_s30, %s530_s30, %s531_s6  }
  0x33   :  { %522 = dma.done.wait [#allocation3], 128  }
  0x34   :  { %523 = vsyncadd [#allocation3], 4294967168 }
  0x35   :  { %524 = dma.done.wait [#allocation6], 2048  }
  0x36   :  { %525 = vsyncadd [#allocation6], 4294965248  ;;  %v533_v0 = vmov 0.0   ;;  %vm534_vm0 = vmmov 0   ;;  %v413_v1 = vld [vmem:[#allocation5] sm:$0xff]   ;;  %v414_v2 = vld [vmem:[#allocation5 + $0x8] sm:$0xff]  }
  0x37   :  { %363 = vmatprep.subr.bf16.mxu0 %v533_v0  ;;  %379 = vmatprep.mubr.msk.bf16.mxu0 %vm534_vm0, %v533_v0  ;;  %v415_v3 = vld [vmem:[#allocation5 + $0x10] sm:$0xff]   ;;  %v422_v4 = vld [vmem:[#allocation7] sm:$0xff]   ;;  %v416_v5 = vld [vmem:[#allocation5 + $0x18] sm:$0xff]   ;;  %s535_s6 = smov [#allocation8]  }
  0x38   :  { %383 = vmatprep.subr.bf16.mxu1 %v533_v0  ;;  %399 = vmatprep.mubr.msk.bf16.mxu1 %vm534_vm0, %v533_v0  ;;  %v423_v6 = vld [vmem:[#allocation7 + $0x8] sm:$0xff]   ;;  %v417_v7 = vld [vmem:[#allocation5 + $0x20] sm:$0xff]   ;;  %v419_v9 = vld [vmem:[#allocation5 + $0x30] sm:$0xff]   ;;  %s313_s7 = sshll.u32 %s535_s6, 4  ;;  %s314_s7 = int_to_ptr.vmem [resolvable:$true] %s313_s7 }
  0x39   :  { %364 = vmatpush3.bf16.msra.mxu0 %v413_v1  ;;  %384 = vmatpush3.bf16.msra.mxu1 %v422_v4  ;;  %v418_v8 = vld [vmem:[#allocation5 + $0x28] sm:$0xff]   ;;  %v420_v10 = vld [vmem:[#allocation5 + $0x38] sm:$0xff]   ;;  %v424_v12 = vld [vmem:[#allocation7 + $0x10] sm:$0xff]   ;;  %s500_s8 = scalar_lea.vmem %s314_s7, 256  ;;  %p505_p11 = scmp.lt.s32.totalorder %s314_s7, %s314_s7 }
  0x3a   :  { %365 = vmatprep.subr.bf16.mxu0 %v533_v0  ;;  %385 = vmatprep.subr.bf16.mxu1 %v533_v0  ;;  %v421_v11 = vld [vmem:[#allocation2] sm:$0xff]   ;;  %v426_v14 = vld [vmem:[#allocation7 + $0x20] sm:$0xff]   ;;  %v427_v15 = vld [vmem:[#allocation7 + $0x28] sm:$0xff]   ;;  %p501_p10 = scmp.ne.s32.totalorder %s314_s7, %s500_s8  ;;  %p506_p12 = scmp.lt.s32.totalorder %s500_s8, %s500_s8 }
  0x3b   :  { %v425_v13 = vld [vmem:[#allocation7 + $0x18] sm:$0xff]   ;;  %v428_v16 = vld [vmem:[#allocation7 + $0x30] sm:$0xff]  }
  0x3c   :  { %v429_v17 = vld [vmem:[#allocation7 + $0x38] sm:$0xff]   ;;  %p507_p13 = por %p506_p12, %p505_p11 }
  0x3d   :  { %366 = vmatpush3.bf16.msra.mxu0 %v414_v2  ;;  %386 = vmatpush3.bf16.msra.mxu1 %v423_v6  ;;  %v326_v18 = vld [vmem:[%s640_s2] ss:$0 sm:$0xff] }
  0x3e   :  { %367 = vmatprep.subr.bf16.mxu0 %v533_v0  ;;  %387 = vmatprep.subr.bf16.mxu1 %v533_v0  ;;  %v336_v36 = vld [vmem:[%s642_s4] ss:$0 sm:$0xff]  ;;  %p508_p0 = pnand %p507_p13, %p501_p10 }
  0x41   :  { %368 = vmatpush3.bf16.msra.mxu0 %v415_v3  ;;  %388 = vmatpush3.bf16.msra.mxu1 %v424_v12 }
  0x42   :  { %369 = vmatprep.subr.bf16.mxu0 %v533_v0  ;;  %389 = vmatprep.subr.bf16.mxu1 %v533_v0 }
  0x45   :  { %370 = vmatpush3.bf16.msra.mxu0 %v416_v5  ;;  %390 = vmatpush3.bf16.msra.mxu1 %v425_v13 }
  0x46   :  { %371 = vmatprep.subr.bf16.mxu0 %v533_v0  ;;  %391 = vmatprep.subr.bf16.mxu1 %v533_v0 }
  0x49   :  { %372 = vmatpush3.bf16.msra.mxu0 %v417_v7  ;;  %392 = vmatpush3.bf16.msra.mxu1 %v426_v14 }
  0x4a   :  { %373 = vmatprep.subr.bf16.mxu0 %v533_v0  ;;  %393 = vmatprep.subr.bf16.mxu1 %v533_v0 }
  0x4d   :  { %374 = vmatpush3.bf16.msra.mxu0 %v418_v8  ;;  %394 = vmatpush3.bf16.msra.mxu1 %v427_v15 }
  0x4e   :  { %375 = vmatprep.subr.bf16.mxu0 %v533_v0  ;;  %395 = vmatprep.subr.bf16.mxu1 %v533_v0 }
  0x51   :  { %376 = vmatpush3.bf16.msra.mxu0 %v419_v9  ;;  %396 = vmatpush3.bf16.msra.mxu1 %v428_v16 }
  0x52   :  { %377 = vmatprep.subr.bf16.mxu0 %v533_v0  ;;  %397 = vmatprep.subr.bf16.mxu1 %v533_v0 }
  0x55   :  { %378 = vmatpush3.bf16.msra.mxu0 %v420_v10  ;;  %398 = vmatpush3.bf16.msra.mxu1 %v429_v17 }
  0x58   :  { %380 = vmatmul.mubr.bf16.vlgmr.msra.gmra.mrb[0].mxu0 %v421_v11 }
 0x12b   :  { %v176_v19 = vpop.f32.mrb[0].mxu0 }
 0x12c   :  { %v177_v20 = vadd.f32 %v326_v18, %v176_v19  ;;  %v381_v21 = vpop.f32.mrb[1].mxu0 }
 0x12d   :  { %v179_v22 = vpop.f32.mrb[2].mxu0 }
 0x12e   :  { %v185_v23 = vmul.f32 0.70710677, %v177_v20  ;;  %v180_v24 = vadd.f32 %v326_v18, %v179_v22  ;;  %v382_v25 = vpop.f32.mrb[3].mxu0  ;;  %v183_v30 = vmul.f32 0.5, %v177_v20 }
 0x130   :  { %430 = verf.f32 %v185_v23  ;;  %v186_v26 = vmul.f32 0.70710677, %v180_v24  ;;  %v184_v31 = vmul.f32 0.5, %v180_v24 }
 0x132   :  { %432 = verf.f32 %v186_v26 }
 0x13a   :  { %v431_v27 = vpop.eup %430 }
 0x13b   :  { %v189_v28 = vadd.f32 1.0, %v431_v27 }
 0x13c   :  { %v433_v29 = vpop.eup %432 }
 0x13d   :  { %v190_v32 = vadd.f32 1.0, %v433_v29  ;;  %v191_v33 = vmul.f32 %v189_v28, %v183_v30 }
 0x13f   :  { %v192_v34 = vmul.f32 %v190_v32, %v184_v31 }
 0x141   :  { %v193_v35 = vpack.c.bf16 %v192_v34, %v191_v33 }
 0x143   :  { %400 = vmatmul.mubr.bf16.vlgmr.msra.gmra.mrb[0].mxu1 %v193_v35 }
 0x216   :  { %v299_v37 = vpop.f32.mrb[0].mxu1 }
 0x217   :  { %v300_v38 = vadd.f32 %v336_v36, %v299_v37  ;;  %v401_v39 = vpop.f32.mrb[1].mxu1 }
 0x218   :  { %v302_v40 = vpop.f32.mrb[2].mxu1 }
 0x219   :  { %306 = vst [vmem:[#allocation8] sm:$0xff] %v300_v38  ;;  %v303_v41 = vadd.f32 %v336_v36, %v302_v40  ;;  %v402_v42 = vpop.f32.mrb[3].mxu1 }
 0x21b   :  { %307 = vst [vmem:[#allocation8 + $0x8] sm:$0xff] %v303_v41 }
 0x21c   :  { %511 = shalt.err (!%p508_p0)
}
 0x21d   :  { %s512_s10 = scalar_lea.hbm %s643_s5, 256 }
 0x21e   :  { %p513_p1 = scmp.ne.s32.totalorder %s643_s5, %s512_s10  ;;  %p516_p2 = scmp.lt.u32.totalorder %s512_s10, %s643_s5 }
 0x220   :  { %p518_p3 = pnand %p516_p2, %p513_p1 }
 0x222   :  { %521 = shalt.err (!%p518_p3)
}
 0x223   :  { %s536_s15 = smov 128   ;;  %s537_s16 = smov 8  }
 0x224   :  { %319 = dma.vmem_to_hbm [thread:$0]  %s314_s7, 256, %s643_s5, [#allocation4], %s536_s15, %s536_s15, %s537_s16  }
 0x225   :  { %526 = dma.done.wait [#allocation4], 256  }
 0x226   :  { %527 = vsyncadd [#allocation4], 4294967040 }
 0x227   :  { %323 = vsyncpa [#allocation3], 1 }
 0x228   :  { %324 = vsyncpa [#allocation6], 1 }
 0x229   :  { %325 = vsyncpa [#allocation4], 1 }

</bundles_post_ra>
